<compile_context>
chip_gen: v7x
topology: tpu7x:2x2x1
jax: 0.10.0
libtpu: 0.0.40
codegen_flags: <defaults>
</compile_context>

<pallas_src>
import jax
import jax.numpy as jnp
from jax.experimental import pallas as pl
from jax.experimental.pallas import tpu as pltpu


def _channel_gate_kernel(x_ref, w1_ref, b1_ref, w2_ref, b2_ref, o_ref):
    # x_ref: (1, C, HW) block (one batch element per grid step)
    # w1: (C, Ch) ; b1: (1, Ch) ; w2: (Ch, C) ; b2: (1, C)
    x = x_ref[...]                          # native dtype, (1, C, HW)
    hw = x.shape[-1]

    # ---- global pools over the spatial (lane) axis, f32 accumulation ----
    # Do the bulk of the reduction as per-vreg VPU adds/maxes over 128-lane
    # chunks so only one short cross-lane (XLU) reduce remains.
    if hw % 128 == 0 and hw > 128:
        n_chunks = hw // 128
        acc_s = x[..., 0:128].astype(jnp.float32)
        acc_m = acc_s
        for i in range(1, n_chunks):
            c = x[..., i * 128:(i + 1) * 128].astype(jnp.float32)
            acc_s = acc_s + c
            acc_m = jnp.maximum(acc_m, c)
    else:
        acc_s = x.astype(jnp.float32)
        acc_m = acc_s

    sum_pool = jnp.sum(acc_s, axis=-1)              # (1, C)
    max_pool = jnp.max(acc_m, axis=-1)              # (1, C)
    avg_pool = sum_pool * (1.0 / hw)                # true H*W divisor

    # ---- shared MLP, both pools as a single (2, C) batch (2 matmuls, not 4) --
    pools = jnp.concatenate([avg_pool, max_pool], axis=0)          # (2, C)
    h = jnp.dot(pools, w1_ref[...], preferred_element_type=jnp.float32) + b1_ref[...]
    h = jnp.maximum(h, 0.0)                                        # ReLU
    att = jnp.dot(h, w2_ref[...], preferred_element_type=jnp.float32) + b2_ref[...]
    att = att[0:1, :] + att[1:2, :]                                # (1, C)
    scale = jax.nn.sigmoid(att)                                    # (1, C) f32

    # Broadcast multiply in the input dtype (no second full-size f32 copy).
    o_ref[...] = (x * scale[:, :, None].astype(x.dtype)).astype(o_ref.dtype)


def channel_gate(x_nchw, w1, b1, w2, b2):
    """x_nchw: (B, C, H, W). Returns same shape/dtype."""
    B, C, H, W = x_nchw.shape
    HW = H * W
    x_flat = x_nchw.reshape(B, C, HW)

    Ch = w1.shape[1]
    w1f = w1.astype(jnp.float32)
    w2f = w2.astype(jnp.float32)
    b1_2d = b1.reshape(1, Ch).astype(jnp.float32)
    b2_2d = b2.reshape(1, C).astype(jnp.float32)

    itemsize = jnp.dtype(x_nchw.dtype).itemsize
    block_bytes = C * HW * itemsize
    weight_bytes = (C * Ch + Ch + Ch * C + C) * 4
    # in + out blocks, double-buffered, plus resident weights and slack.
    vmem_limit = int(min(64 * 1024 * 1024,
                         max(16 * 1024 * 1024,
                             4 * block_bytes + weight_bytes + (2 << 20))))

    cost = pl.CostEstimate(
        flops=3 * B * C * HW + 8 * B * C * Ch,
        transcendentals=B * C,
        bytes_accessed=2 * B * C * HW * itemsize + weight_bytes,
    )

    out = pl.pallas_call(
        _channel_gate_kernel,
        out_shape=jax.ShapeDtypeStruct((B, C, HW), x_nchw.dtype),
        grid=(B,),
        in_specs=[
            pl.BlockSpec((1, C, HW), lambda b: (b, 0, 0)),   # per-batch tile
            pl.BlockSpec((C, Ch), lambda b: (0, 0)),          # resident weights
            pl.BlockSpec((1, Ch), lambda b: (0, 0)),
            pl.BlockSpec((Ch, C), lambda b: (0, 0)),
            pl.BlockSpec((1, C), lambda b: (0, 0)),
        ],
        out_specs=pl.BlockSpec((1, C, HW), lambda b: (b, 0, 0)),
        compiler_params=pltpu.CompilerParams(
            dimension_semantics=("parallel",),
            vmem_limit_bytes=vmem_limit,
        ),
        cost_estimate=cost,
    )(x_flat, w1f, b1_2d, w2f, b2_2d)

    return out.reshape(B, C, H, W)


def reference_channel_gate(x, w1, b1, w2, b2):
    """Pure-JAX reference mirroring the PyTorch ChannelGate forward."""
    B, C, H, W = x.shape
    xf = x.reshape(B, C, -1).astype(jnp.float32)
    avg_p = jnp.mean(xf, axis=-1)
    max_p = jnp.max(xf, axis=-1)

    def mlp(p):
        h = jnp.maximum(p @ w1 + b1, 0.0)
        return h @ w2 + b2

    att = mlp(avg_p) + mlp(max_p)
    scale = jax.nn.sigmoid(att)[:, :, None, None]
    return (x.astype(jnp.float32) * scale).astype(x.dtype)


if __name__ == "__main__":
    # Module-consistent small shapes: gate_channels=64, reduction_ratio=16 -> hidden=4
    B, C, H, W = 2, 64, 8, 8
    reduction_ratio = 16
    Ch = C // reduction_ratio

    key = jax.random.PRNGKey(0)
    kx, k1, kb1, k2, kb2 = jax.random.split(key, 5)

    x = jax.random.normal(kx, (B, C, H, W), dtype=jnp.float32)
    # Deterministic synthetic parameter init (Linear weight shapes from __init__).
    w1 = jax.random.normal(k1, (C, Ch), dtype=jnp.float32) * 0.1   # Linear(C, C//r).weight.T
    b1 = jax.random.normal(kb1, (Ch,), dtype=jnp.float32) * 0.1
    w2 = jax.random.normal(k2, (Ch, C), dtype=jnp.float32) * 0.1   # Linear(C//r, C).weight.T
    b2 = jax.random.normal(kb2, (C,), dtype=jnp.float32) * 0.1

    out = jax.block_until_ready(channel_gate(x, w1, b1, w2, b2))
    ref = reference_channel_gate(x, w1, b1, w2, b2)

    assert out.shape == x.shape
    assert jnp.allclose(out, ref, atol=1e-5, rtol=1e-5), "mismatch vs reference"

    print("KERNEL_OK")
</pallas_src>

<mosaic_0001>
module attributes {stable_mosaic.version = 11 : i64} {
  func.func @_channel_gate_kernel(%arg0: i32, %arg1: memref<1x64x64xf32, #tpu.memory_space<vmem>>, %arg2: memref<64x4xf32, #tpu.memory_space<vmem>>, %arg3: memref<1x4xf32, #tpu.memory_space<vmem>>, %arg4: memref<4x64xf32, #tpu.memory_space<vmem>>, %arg5: memref<1x64xf32, #tpu.memory_space<vmem>>, %arg6: memref<1x64x64xf32, #tpu.memory_space<vmem>>) attributes {dimension_semantics = [#tpu.dimension_semantics<parallel>], iteration_bounds = array<i64: 2>, scalar_prefetch = 0 : i64, scratch_operands = 0 : i64, tpu.core_type = #tpu.core_type<tc>, window_params = [{transform_indices = @transform_0, window_bounds = array<i64: 1, 64, 64>}, {pipeline_mode = #tpu.pipeline_mode<synchronous>, transform_indices = @transform_1, window_bounds = array<i64: 64, 4>}, {pipeline_mode = #tpu.pipeline_mode<synchronous>, transform_indices = @transform_2, window_bounds = array<i64: 1, 4>}, {pipeline_mode = #tpu.pipeline_mode<synchronous>, transform_indices = @transform_3, window_bounds = array<i64: 4, 64>}, {pipeline_mode = #tpu.pipeline_mode<synchronous>, transform_indices = @transform_4, window_bounds = array<i64: 1, 64>}, {transform_indices = @transform_5, window_bounds = array<i64: 1, 64, 64>}]} {
    %c0 = arith.constant 0 : index
    %c0_0 = arith.constant 0 : index
    %c0_1 = arith.constant 0 : index
    %0 = vector.load %arg1[%c0, %c0_0, %c0_1] : memref<1x64x64xf32, #tpu.memory_space<vmem>>, vector<1x64x64xf32>
    %cst = arith.constant dense<0.000000e+00> : vector<1x64xf32>
    %1 = vector.multi_reduction <add>, %0, %cst [2] : vector<1x64x64xf32> to vector<1x64xf32>
    %cst_2 = arith.constant dense<0xFF800000> : vector<1x64xf32>
    %2 = vector.multi_reduction <maximumf>, %0, %cst_2 [2] : vector<1x64x64xf32> to vector<1x64xf32>
    %cst_3 = arith.constant 1.562500e-02 : f32
    %3 = vector.broadcast %cst_3 : f32 to vector<1x64xf32>
    %4 = arith.mulf %1, %3 : vector<1x64xf32>
    %5 = tpu.concatenate %4, %2 in 0 : vector<1x64xf32>, vector<1x64xf32> -> vector<2x64xf32>
    %c0_4 = arith.constant 0 : index
    %c0_5 = arith.constant 0 : index
    %6 = vector.load %arg2[%c0_4, %c0_5] : memref<64x4xf32, #tpu.memory_space<vmem>>, vector<64x4xf32>
    %cst_6 = arith.constant dense<0.000000e+00> : vector<2x4xf32>
    %7 = tpu.matmul %5, %6, %cst_6 {dimension_numbers = #tpu.dot_dimension_numbers<[1], [0], [0], [1], [0, 0, 1, 1], [], []>} : vector<2x64xf32>, vector<64x4xf32>, vector<2x4xf32> -> vector<2x4xf32>
    %c0_7 = arith.constant 0 : index
    %c0_8 = arith.constant 0 : index
    %8 = vector.load %arg3[%c0_7, %c0_8] : memref<1x4xf32, #tpu.memory_space<vmem>>, vector<1x4xf32>
    %9 = vector.broadcast %8 : vector<1x4xf32> to vector<2x4xf32>
    %10 = arith.addf %7, %9 : vector<2x4xf32>
    %cst_9 = arith.constant 0.000000e+00 : f32
    %11 = vector.broadcast %cst_9 : f32 to vector<2x4xf32>
    %12 = arith.maximumf %10, %11 : vector<2x4xf32>
    %c0_10 = arith.constant 0 : index
    %c0_11 = arith.constant 0 : index
    %13 = vector.load %arg4[%c0_10, %c0_11] : memref<4x64xf32, #tpu.memory_space<vmem>>, vector<4x64xf32>
    %cst_12 = arith.constant dense<0.000000e+00> : vector<2x64xf32>
    %14 = tpu.matmul %12, %13, %cst_12 {dimension_numbers = #tpu.dot_dimension_numbers<[1], [0], [0], [1], [0, 0, 1, 1], [], []>} : vector<2x4xf32>, vector<4x64xf32>, vector<2x64xf32> -> vector<2x64xf32>
    %c0_13 = arith.constant 0 : index
    %c0_14 = arith.constant 0 : index
    %15 = vector.load %arg5[%c0_13, %c0_14] : memref<1x64xf32, #tpu.memory_space<vmem>>, vector<1x64xf32>
    %16 = vector.broadcast %15 : vector<1x64xf32> to vector<2x64xf32>
    %17 = arith.addf %14, %16 : vector<2x64xf32>
    %18 = vector.extract_strided_slice %17 {offsets = [0, 0], sizes = [1, 64], strides = [1, 1]} : vector<2x64xf32> to vector<1x64xf32>
    %19 = vector.extract_strided_slice %17 {offsets = [1, 0], sizes = [1, 64], strides = [1, 1]} : vector<2x64xf32> to vector<1x64xf32>
    %20 = arith.addf %18, %19 : vector<1x64xf32>
    %21 = arith.negf %20 : vector<1x64xf32>
    %22 = math.exp %21 : vector<1x64xf32>
    %cst_15 = arith.constant 1.000000e+00 : f32
    %23 = vector.broadcast %cst_15 : f32 to vector<1x64xf32>
    %24 = arith.addf %23, %22 : vector<1x64xf32>
    %25 = arith.divf %23, %24 : vector<1x64xf32>
    %26 = vector.shape_cast %25 : vector<1x64xf32> to vector<1x64x1xf32>
    %27 = vector.broadcast %26 : vector<1x64x1xf32> to vector<1x64x64xf32>
    %28 = arith.mulf %0, %27 : vector<1x64x64xf32>
    %c0_16 = arith.constant 0 : index
    %c0_17 = arith.constant 0 : index
    %c0_18 = arith.constant 0 : index
    %29 = vector.load %arg6[%c0_16, %c0_17, %c0_18] : memref<1x64x64xf32, #tpu.memory_space<vmem>>, vector<1x64x64xf32>
    tpu.vector_store %arg6[%c0_16, %c0_17, %c0_18], %28 {strides = array<i32>} : memref<1x64x64xf32, #tpu.memory_space<vmem>>, vector<1x64x64xf32>,
    return
  }
  func.func @transform_0(%arg0: i32) -> (i32, i32, i32) {
    %c0_i32 = arith.constant 0 : i32
    %c0_i32_0 = arith.constant 0 : i32
    %c0_i32_1 = arith.constant 0 : i32
    return %arg0, %c0_i32, %c0_i32_0 : i32, i32, i32
  }
  func.func @transform_1(%arg0: i32) -> (i32, i32) {
    %c0_i32 = arith.constant 0 : i32
    %c0_i32_0 = arith.constant 0 : i32
    %c0_i32_1 = arith.constant 0 : i32
    return %c0_i32, %c0_i32_0 : i32, i32
  }
  func.func @transform_2(%arg0: i32) -> (i32, i32) {
    %c0_i32 = arith.constant 0 : i32
    %c0_i32_0 = arith.constant 0 : i32
    %c0_i32_1 = arith.constant 0 : i32
    return %c0_i32, %c0_i32_0 : i32, i32
  }
  func.func @transform_3(%arg0: i32) -> (i32, i32) {
    %c0_i32 = arith.constant 0 : i32
    %c0_i32_0 = arith.constant 0 : i32
    %c0_i32_1 = arith.constant 0 : i32
    return %c0_i32, %c0_i32_0 : i32, i32
  }
  func.func @transform_4(%arg0: i32) -> (i32, i32) {
    %c0_i32 = arith.constant 0 : i32
    %c0_i32_0 = arith.constant 0 : i32
    %c0_i32_1 = arith.constant 0 : i32
    return %c0_i32, %c0_i32_0 : i32, i32
  }
  func.func @transform_5(%arg0: i32) -> (i32, i32, i32) {
    %c0_i32 = arith.constant 0 : i32
    %c0_i32_0 = arith.constant 0 : i32
    %c0_i32_1 = arith.constant 0 : i32
    return %arg0, %c0_i32, %c0_i32_0 : i32, i32, i32
  }
}

</mosaic_0001>

<bundles_post_ra>
// kernel: tpu_custom_call.1
= control target key start
LH: loop header
LB: loop body
LE: loop exit
PB: predicated region body
PF: predicated region fallthrough
CT: control target
= control target key end

     0   :  { %10 = vsyncpa [#allocation3], 0  ;;  %s1301_s0 = inlined_call_operand.hbm [shape: f32[2,64,64], index: 0, kind: input, shape index: {}]   ;;  %s1302_s1 = inlined_call_operand.vmem [shape: f32[64,4], index: 1, kind: input, shape index: {}]   ;;  %s1303_s2 = inlined_call_operand.vmem [shape: f32[1,4], index: 2, kind: input, shape index: {}]   ;;  %s1304_s3 = inlined_call_operand.vmem [shape: f32[4,64], index: 3, kind: input, shape index: {}]   ;;  %s1305_s4 = inlined_call_operand.vmem [shape: f32[1,64], index: 4, kind: input, shape index: {}]   ;;  %s1306_s5 = inlined_call_operand.hbm [shape: f32[2,64,64], index: 5, kind: output, shape index: {}]  }
   0x1   :  { %12 = vsyncpa [#allocation3 + $0x1], 0 }
   0x2   :  { %13 = vsyncpa [#allocation4], 0 }
   0x3   :  { %15 = vsyncpa [#allocation4 + $0x1], 0  ;;  %s1008_s18 = smov 0   ;;  %s1010_s19 = smov 0  }
   0x4   :  { %s1012_s20 = smov 0   ;;  %s1014_s21 = smov 0  }
   0x5 LB: > { %s1029_s22 = sadd.s32 4294967295, %s967_s21   ;;  %s745_s23 = sadd.s32 4294967294, %s967_s21   ;;  %s967_s21 = sphi %s1014_s21, %s1319_s21   ;;  %s963_s20 = sphi %s1012_s20, %s1318_s20   ;;  %s959_s19 = sphi %s1010_s19, %s1317_s19   ;;  %s955_s18 = sphi %s1008_s18, %s1316_s18  }
   0x6   : > { %s1033_s24 = sadd.s32 1, %s967_s21   ;;  %s28_s25 = sadd.s32 1, %s963_s20 }
   0x7   : > { %s25_s26 = ssub.s32 %s967_s21, %s1033_s24  ;;  %p35_p0 = scmp.ne.s32.totalorder %s963_s20, %s959_s19 }
   0x8   : > { %p26_p1 = scmp.eq.s32.totalorder %s25_s26, 0  ;;  %p36_p2 = scmp.eq.s32.totalorder %s967_s21, 0 }
   0x9   : > { %p41_p3 = scmp.ne.s32.totalorder %s959_s19, %s955_s18  ;;  %p42_p4 = scmp.eq.s32.totalorder %s1029_s22, 0 }
   0xa   : > { %s1045_s27 = scalar_select %p26_p1, %s963_s20, %s28_s25  }
   0xb   : > { %p1047_p5 = por %p36_p2, %p35_p0  ;;  %p1051_p6 = por %p42_p4, %p41_p3 }
   0xc   : > { %p149_p7 = scmp.eq.s32.totalorder %s1029_s22, 1  ;;  %p155_p8 = scmp.eq.s32.totalorder %s745_s23, 1 }
   0xd   : > { %p826_p10 = scmp.lt.s32.totalorder %s967_s21, 2  ;;  %s187_s7 = sand.u32 1, %s963_s20  }
   0xe   : > { %p1058_p11 = por %p149_p7, %p35_p0  ;;  %p1062_p12 = por %p155_p8, %p41_p3 }
   0xf   : > { %s765_s8 = sshll.u32 %s967_s21, 10  ;;  %s748_s9 = sshll.u32 %s187_s7, 6 }
  0x10   : > { %s1310_s30 = scalar_select %p1058_p11, 1, 0 }
  0x11   : > { %s1311_s6 = scalar_select %p1062_p12, 1, 0 }
  0x12   : > { %s1071_s12 = scalar_lea.hbm %s1301_s0, %s765_s8  ;;  %s191_s13 = scalar_lea.vmem [#allocation2], %s748_s9 }
  0x13   : > { %s198_s14 = sshll.u32 %s191_s13, 4  ;;  %p1075_p13 = pnand %p826_p10, %p1047_p5  ;;  %s1079_s14 = int_to_ptr.vmem [resolvable:$true] %s198_s14 }
  0x14   : > { %s1081_s16 = scalar_lea.sflag [#allocation3], %s187_s7  ;;  %s871_s17 = scalar_lea.hbm %s1071_s12, 1024 }
  0x15   : > { %p872_p0 = scmp.ne.s32.totalorder %s1071_s12, %s871_s17  ;;  %p873_p1 = pneg %p1075_p13 }
  0x16   : > { %s876_s26 = scalar_lea.hbm %s1301_s0, 2048  ;;  %p877_p4 = scmp.lt.u32.totalorder %s1071_s12, %s1301_s0 }
  0x17   : > { %p874_p2 = pnand %p873_p1, %p872_p0  ;;  %p878_p5 = scmp.lt.u32.totalorder %s876_s26, %s871_s17 }
  0x18   : > { %p880_p8 = scmp.lt.u32.totalorder %s871_s17, %s1071_s12 }
  0x19   : > { %p875_p3 = pneg %p874_p2  ;;  %p879_p7 = por %p878_p5, %p877_p4 }
  0x1b   : > { %p881_p10 = por %p880_p8, %p879_p7 }
  0x1d   : > { %p882_p9 = pnand %p881_p10, %p875_p3 }
  0x1f   : > { %885 = shalt.err (!%p882_p9)
}
  0x20   : > { %s886_s7 = scalar_lea.vmem %s1079_s14, 1024  ;;  %s969_s9 = smov [#allocation2]  }
  0x21   : > { %p887_p0 = scmp.ne.s32.totalorder %s1079_s14, %s886_s7  ;;  %s891_s10 = sshll.u32 %s969_s9, 4  ;;  %s892_s10 = int_to_ptr.vmem [resolvable:$false] %s891_s10 }
  0x22   : > { %s893_s11 = scalar_lea.vmem %s892_s10, 2048  ;;  %p894_p11 = scmp.lt.s32.totalorder %s1079_s14, %s892_s10 }
  0x23   : > { %p889_p2 = pnand %p887_p0, %p873_p1  ;;  %p895_p4 = scmp.lt.s32.totalorder %s893_s11, %s886_s7 }
  0x25   : > { %p890_p12 = pneg %p889_p2  ;;  %p896_p5 = por %p895_p4, %p894_p11 }
  0x27   : > { %p897_p7 = pnand %p896_p5, %p890_p12 }
  0x29   : > { %900 = shalt.err (!%p897_p7)
}
  0x2a   : > { %s970_s13 = smov 128   ;;  %s971_s17 = smov 8  }
  0x2b   : > { %821 = dma.hbm_to_vmem [thread:$0]  (!%p1075_p13), %s1071_s12, 1024, %s1079_s14, %s1081_s16, %s970_s13, %s970_s13, %s971_s17  }
  0x2c   : > { %p751_p9 = scmp.ge.s32.totalorder %s967_s21, 1  ;;  %p206_p1 = scmp.lt.s32.totalorder %s967_s21, 3 }
  0x2e   : > { %p207_p3 = pnand %p751_p9, %p206_p1 }
  0x2f   : > { %s1112_s23 = sand.u32 (!%p207_p3), 1, %s959_s19  }
  0x30   : > { %210 = sbr.rel (%p207_p3) target bundleno = 843 (0x34b), region = 40  ;;  %s752_s25 = sshll.u32 (!%p207_p3), %s1112_s23, 6 }
  0x31   : > { %s213_s26 = scalar_lea.sflag (!%p207_p3), [#allocation3], %s1112_s23  ;;  %s1118_s28 = scalar_lea.vmem (!%p207_p3), [#allocation2], %s752_s25 }
  0x37   : > { %946 = dma.done.wait (%p1051_p6), %s213_s26, 1024  }
  0x38   : > { %948 = vsyncadd (%p1051_p6), %s213_s26, 4294966272  ;;  %vm251_vm0 = vcmask 523264   ;;  %v1125_v0 = vld [vmem:[%s1118_s28 + $0x10] sm:$0xff]  ;;  %v1128_v1 = vld [vmem:[%s1118_s28] sm:$0xff]  ;;  %v972_v27 = vmov 0.0|0.0   ;;  %vm973_vm1 = vmmov 0   ;;  %v316_v40 = vlaneseq }
  0x39   : > { %v1131_v2 = vld [vmem:[%s1118_s28 + $0x18] sm:$0xff]  ;;  %v258_v3 = vsel %vm251_vm0, %v1125_v0, 0.0  ;;  %v252_v4 = vsel %vm251_vm0, %v1128_v1, 0.0  ;;  %v1138_v5 = vld [vmem:[%s1118_s28 + $0x8] sm:$0xff]  ;;  %v276_v9 = vsel %vm251_vm0, %v1128_v1, -inf  ;;  %v1149_v10 = vld [vmem:[%s1118_s28 + $0x20] sm:$0xff]  ;;  %802 = vmatprep.subr.bf16.mxu0 %v972_v27 }
  0x3a   : > { %259 = vadd.xlane.f32.xlu1 %v258_v3  ;;  %253 = vadd.xlane.f32.xlu0 %v252_v4  ;;  %v261_v6 = vsel %vm251_vm0, %v1131_v2, 0.0  ;;  %v255_v7 = vsel %vm251_vm0, %v1138_v5, 0.0  ;;  %v279_v8 = vsel %vm251_vm0, %v1138_v5, -inf  ;;  %v282_v11 = vsel %vm251_vm0, %v1125_v0, -inf  ;;  %v1156_v13 = vld [vmem:[%s1118_s28 + $0x28] sm:$0xff]  ;;  %v1163_v16 = vld [vmem:[%s1118_s28 + $0x30] sm:$0xff] }
  0x3b   : > { %v264_v12 = vsel %vm251_vm0, %v1149_v10, 0.0  ;;  %v285_v14 = vsel %vm251_vm0, %v1131_v2, -inf  ;;  %v267_v15 = vsel %vm251_vm0, %v1156_v13, 0.0  ;;  %v288_v17 = vsel %vm251_vm0, %v1149_v10, -inf  ;;  %v1170_v19 = vld [vmem:[%s1118_s28 + $0x38] sm:$0xff]  ;;  %v422_v24 = vld [vmem:[%s1302_s1] sm:$0xff] }
  0x3c   : > { %v270_v18 = vsel %vm251_vm0, %v1163_v16, 0.0  ;;  %v291_v20 = vsel %vm251_vm0, %v1156_v13, -inf  ;;  %v273_v21 = vsel %vm251_vm0, %v1170_v19, 0.0  ;;  %v294_v22 = vsel %vm251_vm0, %v1163_v16, -inf  ;;  %v423_v25 = vld [vmem:[%s1302_s1 + $0x8] sm:$0xff]  ;;  %v424_v28 = vld [vmem:[%s1302_s1 + $0x10] sm:$0xff] }
  0x3d   : > { %v297_v23 = vsel %vm251_vm0, %v1170_v19, -inf  ;;  %v803_v26 = vpack.c.bf16 %v423_v25, %v422_v24  ;;  %v425_v29 = vld [vmem:[%s1302_s1 + $0x18] sm:$0xff]  ;;  %v426_v31 = vld [vmem:[%s1302_s1 + $0x20] sm:$0xff]  ;;  %v427_v32 = vld [vmem:[%s1302_s1 + $0x28] sm:$0xff]  ;;  %v974_v37 = vmov 0.0   ;;  %v317_v43 = vand.u32 127, %v316_v40 }
  0x3e   : > { %262 = vadd.xlane.f32.xlu1 %v261_v6  ;;  %256 = vadd.xlane.f32.xlu0 %v255_v7  ;;  %v806_v30 = vpack.c.bf16 %v425_v29, %v424_v28  ;;  %v809_v33 = vpack.c.bf16 %v427_v32, %v426_v31  ;;  %v428_v34 = vld [vmem:[%s1302_s1 + $0x30] sm:$0xff]  ;;  %v429_v35 = vld [vmem:[%s1302_s1 + $0x38] sm:$0xff]  ;;  %v1204_v47 = vshrl.u32 %v316_v40, 7  ;;  %vm327_vm2 = vcmask 130112   ;;  %s242_s10 = scalar_lea.vmem [#allocation5], %s752_s25  ;;  %s766_s25 = sshll.u32 %s1029_s22, 10 }
  0x3f   : > { %804 = vmatpush3.bf16.msra.mxu0 %v803_v26  ;;  %v812_v36 = vpack.c.bf16 %v429_v35, %v428_v34  ;;  %794 = vmatprep.mubr.msk.f32.mxu0 %vm973_vm1, %v974_v37  ;;  %v322_v46 = vadd.s32 4294967288, %v317_v43  ;;  %v329_v52 = vadd.s32 4294967280, %v317_v43  ;;  %v336_v55 = vadd.s32 4294967272, %v317_v43  ;;  %s672_s11 = sshll.u32 %s242_s10, 4  ;;  %s1253_s26 = scalar_lea.hbm %s1306_s5, %s766_s25  ;;  %s1255_s11 = int_to_ptr.vmem [resolvable:$true] %s672_s11 }
  0x40   : > { %805 = vmatprep.subr.bf16.mxu0 %v972_v27  ;;  %797 = vmatprep.subr.mxu1 %v974_v37  ;;  %v320_v53 = vsub.s32 %v317_v43, %v1204_v47  ;;  %v343_v58 = vadd.s32 4294967264, %v317_v43  ;;  %v350_v59 = vadd.s32 4294967256, %v317_v43  ;;  %v357_v63 = vadd.s32 4294967248, %v317_v43  ;;  %s659_s28 = scalar_lea.sflag [#allocation4], %s1112_s23  ;;  %s901_s22 = scalar_lea.vmem %s1255_s11, 1024 }
  0x41   : > { %799 = vmatprep.mubr.msk.f32.mxu1 %vm973_vm1, %v974_v37  ;;  %v325_v50 = vsub.s32 %v322_v46, %v1204_v47  ;;  %v332_v61 = vsub.s32 %v329_v52, %v1204_v47  ;;  %v339_v4 = vsub.s32 %v336_v55, %v1204_v47  ;;  %vm334_vm3 = vcmask 195712   ;;  %p902_p6 = scmp.ne.s32.totalorder %s1255_s11, %s901_s22  ;;  %p1313_p11 = scmp.ne.s32.totalorder %s1310_s30, 0 }
  0x42   : > { %280 = vmax.xlane.f32.xlu1 %v279_v8  ;;  %277 = vmax.xlane.f32.xlu0 %v276_v9  ;;  %v364_v9 = vadd.s32 4294967240, %v317_v43  ;;  %vm341_vm4 = vcmask 261312   ;;  %vm348_vm5 = vcmask 326912   ;;  %vm355_vm6 = vcmask 392512   ;;  %s975_s29 = smov [#allocation5]  }
  0x43   : > { %807 = vmatpush3.bf16.msra.mxu0 %v806_v30  ;;  %vm362_vm7 = vcmask 458112   ;;  %vm369_vm8 = vcmask 523712   ;;  %vm420_vm9 = vcmask 1040384   ;;  %vm523_vm10 = vcmask 1043456   ;;  %p903_p12 = pnand %p902_p6, %p1313_p11  ;;  %s905_s12 = sshll.u32 %s975_s29, 4  ;;  %s906_s12 = int_to_ptr.vmem [resolvable:$false] %s905_s12 }
  0x44   : > { %808 = vmatprep.subr.bf16.mxu0 %v972_v27  ;;  %v367_v28 = vsub.s32 %v364_v9, %v1204_v47  ;;  %vm519_vm11 = vcmask 31744   ;;  %s907_s14 = scalar_lea.vmem %s906_s12, 2048  ;;  %p908_p8 = scmp.lt.s32.totalorder %s1255_s11, %s906_s12 }
  0x45   : > { %p904_p13 = pneg %p903_p12  ;;  %p909_p10 = scmp.lt.s32.totalorder %s907_s14, %s901_s22 }
  0x46   : > { %283 = vmax.xlane.f32.xlu1 %v282_v11  ;;  %265 = vadd.xlane.f32.xlu0 %v264_v12  ;;  %v346_v11 = vsub.s32 %v343_v58, %v1204_v47 }
  0x47   : > { %810 = vmatpush3.bf16.msra.mxu0 %v809_v33  ;;  %p910_p0 = por %p909_p10, %p908_p8 }
  0x48   : > { %811 = vmatprep.subr.bf16.mxu0 %v972_v27 }
  0x49   : > { %p911_p2 = pnand %p910_p0, %p904_p13 }
  0x4a   : > { %286 = vmax.xlane.f32.xlu1 %v285_v14  ;;  %268 = vadd.xlane.f32.xlu0 %v267_v15  ;;  %v353_v14 = vsub.s32 %v350_v59, %v1204_v47 }
  0x4b   : > { %813 = vmatpush3.bf16.msra.mxu0 %v812_v36 }
  0x4e   : > { %289 = vmax.xlane.f32.xlu1 %v288_v17  ;;  %271 = vadd.xlane.f32.xlu0 %v270_v18 }
  0x52   : > { %292 = vmax.xlane.f32.xlu1 %v291_v20  ;;  %274 = vadd.xlane.f32.xlu0 %v273_v21 }
  0x56   : > { %295 = vmax.xlane.f32.xlu0 %v294_v22  ;;  %298 = vmax.xlane.f32.xlu1 %v297_v23  ;;  %v360_v23 = vsub.s32 %v357_v63, %v1204_v47 }
  0xc7   : > { %v260_v38 = vpop.xlane.xlu1 %259  ;;  %v254_v39 = vpop.xlane.xlu0 %253 }
  0xc8   : > { %v300_v54 = vmul.f32 0.015625, %v254_v39  ;;  %v302_v62 = vmul.f32 0.015625, %v260_v38 }
  0xca   : > { %v321_v3 = vrot.slane %v300_v54, %v320_v53  ;;  %v333_v21 = vrot.slane %v302_v62, %v332_v61  ;;  %v756_v62 = vld [vmem:[%s1305_s4] ss:$0 sm:$0xff] }
  0xcb   : > { %v263_v41 = vpop.xlane.xlu1 %262  ;;  %v257_v42 = vpop.xlane.xlu0 %256 }
  0xcc   : > { %v301_v51 = vmul.f32 0.015625, %v257_v42  ;;  %v303_v6 = vmul.f32 0.015625, %v263_v41 }
  0xce   : > { %v326_v60 = vrot.slane %v301_v51, %v325_v50  ;;  %v340_v25 = vrot.slane %v303_v6, %v339_v4 }
  0xcf   : > { %v281_v44 = vpop.xlane.xlu1 %280  ;;  %v278_v45 = vpop.xlane.xlu0 %277 }
  0xd0   : > { %v328_v15 = vsel %vm327_vm2, %v326_v60, %v321_v3  ;;  %v387_v17 = vrot.slane %v281_v44, %v325_v50  ;;  %v383_v18 = vrot.slane %v278_v45, %v320_v53 }
  0xd1   : > { %v335_v30 = vsel %vm334_vm3, %v333_v21, %v328_v15 }
  0xd2   : > { %v388_v34 = vsel %vm327_vm2, %v387_v17, %v383_v18  ;;  %v342_v39 = vsel %vm341_vm4, %v340_v25, %v335_v30 }
  0xd3   : > { %v284_v48 = vpop.xlane.xlu1 %283  ;;  %v266_v49 = vpop.xlane.xlu0 %265 }
  0xd4   : > { %v304_v12 = vmul.f32 0.015625, %v266_v49  ;;  %v392_v22 = vrot.slane %v284_v48, %v332_v61 }
  0xd6   : > { %v347_v31 = vrot.slane %v304_v12, %v346_v11  ;;  %v393_v37 = vsel %vm334_vm3, %v392_v22, %v388_v34  ;;  %v609_v12 = vsub.s32 0, %v1204_v47 }
  0xd7   : > { %v287_v56 = vpop.xlane.xlu1 %286  ;;  %v269_v57 = vpop.xlane.xlu0 %268 }
  0xd8   : > { %v305_v20 = vmul.f32 0.015625, %v269_v57  ;;  %v397_v26 = vrot.slane %v287_v56, %v339_v4  ;;  %v349_v44 = vsel %vm348_vm5, %v347_v31, %v342_v39  ;;  %v511_v56 = vld [vmem:[%s1304_s3] sm:$0xf] }
  0xd9   : > { %798 = vmatpush3.msk.msra.mxu1 %vm523_vm10, %v511_v56  ;;  %v754_v57 = vld [vmem:[%s1303_s2] ss:$0 sm:$0xff] }
  0xda   : > { %v354_v35 = vrot.slane %v305_v20, %v353_v14  ;;  %v398_v40 = vsel %vm341_vm4, %v397_v26, %v393_v37 }
  0xdb   : > { %v290_v7 = vpop.xlane.xlu1 %289  ;;  %v272_v8 = vpop.xlane.xlu0 %271 }
  0xdc   : > { %v306_v24 = vmul.f32 0.015625, %v272_v8  ;;  %v402_v32 = vrot.slane %v290_v7, %v346_v11  ;;  %v356_v49 = vsel %vm355_vm6, %v354_v35, %v349_v44 }
  0xde   : > { %v361_v38 = vrot.slane %v306_v24, %v360_v23  ;;  %v403_v45 = vsel %vm348_vm5, %v402_v32, %v398_v40 }
  0xdf   : > { %v293_v27 = vpop.xlane.xlu1 %292  ;;  %v275_v29 = vpop.xlane.xlu0 %274 }
  0xe0   : > { %v307_v33 = vmul.f32 0.015625, %v275_v29  ;;  %v407_v36 = vrot.slane %v293_v27, %v353_v14  ;;  %v363_v51 = vsel %vm362_vm7, %v361_v38, %v356_v49 }
  0xe2   : > { %v368_v41 = vrot.slane %v307_v33, %v367_v28  ;;  %v408_v50 = vsel %vm355_vm6, %v407_v36, %v403_v45 }
  0xe3   : > { %v296_v42 = vpop.xlane.xlu0 %295  ;;  %v299_v43 = vpop.xlane.xlu1 %298 }
  0xe4   : > { %v412_v46 = vrot.slane %v296_v42, %v360_v23  ;;  %v417_v48 = vrot.slane %v299_v43, %v367_v28  ;;  %v370_v54 = vsel %vm369_vm8, %v368_v41, %v363_v51 }
  0xe6   : > { %v413_v52 = vsel %vm362_vm7, %v412_v46, %v408_v50 }
  0xe7   : > { %v418_v53 = vsel %vm369_vm8, %v417_v48, %v413_v52 }
  0xe8   : > { %v421_v55 = vsel %vm420_vm9, %v370_v54, %v418_v53 }
  0xe9   : > { %795 = vmatmul.mubr.msk.f32.vlgmr.msra.gmra.mrb[0].mxu0 %vm251_vm0, %v421_v55 }
 0x1bc   : > { %v506_v58 = vpop.f32.mrb[0].mxu0 }
 0x1bd   : > { %v507_v59 = vadd.f32 %v754_v57, %v506_v58  ;;  %v796_v60 = vpop.f32.mrb[1].mxu0 }
 0x1bf   : > { %v510_v61 = vmax.f32 %v507_v59, 0.0 }
 0x1c1   : > { %800 = vmatmul.mubr.msk.f32.vlgmr.msra.gmra.mrb[0].mxu1 %vm519_vm11, %v510_v61 }
 0x294   : > { %v593_v63 = vpop.f32.mrb[0].mxu1 }
 0x295   : > { %v594_v3 = vadd.f32 %v756_v62, %v593_v63  ;;  %v801_v4 = vpop.f32.mrb[1].mxu1 }
 0x297   : > { %v598_v6 = vrot.slane %v594_v3, 1 }
 0x299   : > { %v600_v7 = vadd.f32 %v598_v6, %v594_v3 }
 0x29b   : > { %v759_v8 = vmul.f32 -1.442695, %v600_v7 }
 0x29d   : > { %867 = vpow2.f32 %v759_v8 }
 0x2a7   : > { %v868_v9 = vpop.eup %867 }
 0x2a8   : > { %v604_v11 = vadd.f32 1.0, %v868_v9 }
 0x2aa   : > { %869 = vrcp.f32 %v604_v11 }
 0x2b4   : > { %v870_v14 = vpop.eup %869 }
 0x2b5   : > { %v610_v15 = vrot.slane %v870_v14, %v609_v12 }
 0x2b7   : > { %616 = vbcast.lane.b32.xlu1 %v610_v15, 264  ;;  %612 = vbcast.lane.b32.xlu0 %v610_v15, 256 }
 0x2bb   : > { %620 = vbcast.lane.b32.xlu1 %v610_v15, 272  ;;  %628 = vbcast.lane.b32.xlu0 %v610_v15, 288 }
 0x2bf   : > { %624 = vbcast.lane.b32.xlu1 %v610_v15, 280  ;;  %636 = vbcast.lane.b32.xlu0 %v610_v15, 304 }
 0x2c3   : > { %632 = vbcast.lane.b32.xlu1 %v610_v15, 296 }
 0x2c7   : > { %640 = vbcast.lane.b32.xlu1 %v610_v15, 312 }
 0x329   : > { %v617_v17 = vpop.permute.xlu1 %616  ;;  %v613_v18 = vpop.permute.xlu0 %612 }
 0x32a   : > { %v643_v20 = vmul.f32 %v617_v17, %v1138_v5  ;;  %v642_v21 = vmul.f32 %v613_v18, %v1128_v1 }
 0x32c   : > { %651 = vst.msk [vmem:[%s242_s10 + $0x8] sm:$0xff] %vm251_vm0, %v643_v20  ;;  %650 = vst.msk [vmem:[%s242_s10] sm:$0xff] %vm251_vm0, %v642_v21 }
 0x32d   : > { %v621_v47 = vpop.permute.xlu1 %620  ;;  %v629_v22 = vpop.permute.xlu0 %628 }
 0x32e   : > { %v644_v23 = vmul.f32 %v621_v47, %v1125_v0  ;;  %v646_v24 = vmul.f32 %v629_v22, %v1149_v10 }
 0x330   : > { %652 = vst.msk [vmem:[%s242_s10 + $0x10] sm:$0xff] %vm251_vm0, %v644_v23  ;;  %654 = vst.msk [vmem:[%s242_s10 + $0x20] sm:$0xff] %vm251_vm0, %v646_v24 }
 0x331   : > { %v625_v5 = vpop.permute.xlu1 %624  ;;  %v637_v1 = vpop.permute.xlu0 %636 }
 0x332   : > { %v645_v25 = vmul.f32 %v625_v5, %v1131_v2  ;;  %v648_v26 = vmul.f32 %v637_v1, %v1163_v16 }
 0x334   : > { %653 = vst.msk [vmem:[%s242_s10 + $0x18] sm:$0xff] %vm251_vm0, %v645_v25  ;;  %656 = vst.msk [vmem:[%s242_s10 + $0x30] sm:$0xff] %vm251_vm0, %v648_v26 }
 0x335   : > { %v633_v27 = vpop.permute.xlu1 %632 }
 0x336   : > { %v647_v0 = vmul.f32 %v633_v27, %v1156_v13 }
 0x338   : > { %655 = vst.msk [vmem:[%s242_s10 + $0x28] sm:$0xff] %vm251_vm0, %v647_v0 }
 0x339   : > { %v641_v10 = vpop.permute.xlu1 %640 }
 0x33a   : > { %v649_v2 = vmul.f32 %v641_v10, %v1170_v19 }
 0x33c   : > { %657 = vst.msk [vmem:[%s242_s10 + $0x38] sm:$0xff] %vm251_vm0, %v649_v2 }
 0x33d   : > { %914 = shalt.err (!%p911_p2)
}
 0x33e   : > { %s915_s15 = scalar_lea.hbm %s1253_s26, 1024  ;;  %s919_s7 = scalar_lea.hbm %s1306_s5, 2048 }
 0x33f   : > { %p916_p4 = scmp.ne.s32.totalorder %s1253_s26, %s915_s15  ;;  %p920_p9 = scmp.lt.u32.totalorder %s1253_s26, %s1306_s5 }
 0x340   : > { %p921_p1 = scmp.lt.u32.totalorder %s919_s7, %s915_s15  ;;  %p923_p6 = scmp.lt.u32.totalorder %s915_s15, %s1253_s26 }
 0x341   : > { %p917_p5 = pnand %p916_p4, %p1313_p11 }
 0x342   : > { %p922_p3 = por %p921_p1, %p920_p9 }
 0x343   : > { %p918_p7 = pneg %p917_p5 }
 0x344   : > { %p924_p12 = por %p923_p6, %p922_p3 }
 0x346   : > { %p925_p13 = pnand %p924_p12, %p918_p7 }
 0x348   : > { %928 = shalt.err (!%p925_p13)
}
 0x349   : > { %s976_s25 = smov 128   ;;  %s977_s13 = smov 8  }
 0x34a   : > { %816 = dma.vmem_to_hbm [thread:$0]  (%p1313_p11), %s1255_s11, 1024, %s1253_s26, %s659_s28, %s976_s25, %s976_s25, %s977_s13  }
 0x34b PF: > { %s687_s17 = sand.u32 1, %s955_s18   ;;  %p1314_p8 = scmp.ne.s32.totalorder %s1311_s6, 0 }
 0x34c   : > { %p1315_p10 = scmp.ge.s32.totalorder %s967_s21, 2  ;;  %s688_s22 = scalar_lea.sflag [#allocation4], %s687_s17 }
 0x34e   : > { %p823_p0 = pnand %p1315_p10, %p1314_p8 }
 0x350   : > { %950 = dma.done.wait (!%p823_p0), %s688_s22, 1024  }
 0x351   : > { %952 = vsyncadd (!%p823_p0), %s688_s22, 4294966272  ;;  %p18_p2 = scmp.ge.s32.totalorder %s1033_s24, 4   ;;  %s1316_s18 = smov %s959_s19 }
 0x352   : > { %s1317_s19 = smov %s963_s20  ;;  %s1318_s20 = smov %s1045_s27 }
 0x353   : > { %s1319_s21 = smov %s1033_s24  ;;  %20 = sbr.rel (!%p18_p2) target bundleno = 5 (0x5), region = 85 }
 0x35a   :  { %693 = vsyncpa [#allocation3], 1 }
 0x35b   :  { %695 = vsyncpa [#allocation3 + $0x1], 1 }
 0x35c   :  { %696 = vsyncpa [#allocation4], 1 }
 0x35d   :  { %698 = vsyncpa [#allocation4 + $0x1], 1 }

</bundles_post_ra>
